<compile_context>
chip_gen: v7x
topology: tpu7x:2x2x1
jax: 0.10.0
libtpu: 0.0.40
codegen_flags: <defaults>
</compile_context>

<pallas_src>
import functools

import jax
import jax.numpy as jnp
from jax.experimental import pallas as pl
from jax.experimental.pallas import tpu as pltpu


# --------------------------------------------------------------------------
# Kernel: full 3-layer MLP on one (D_in, TB) batch-column tile.
# Weights are resident (same block every grid step), f32 accumulate,
# f32 bias/relu/tanh epilogue, lane-dense (D_out, TB) store.
# --------------------------------------------------------------------------
def _mlp_kernel(xT_ref, w1_ref, b1_ref, w2_ref, b2_ref, w3_ref, b3_ref,
                outT_ref, *, actor: bool):
    xT = xT_ref[...]                                         # (D_in, TB)

    # fc1 + relu : (H1, D_in) @ (D_in, TB) -> (H1, TB)
    h1 = jnp.dot(w1_ref[...], xT, preferred_element_type=jnp.float32)
    h1 = jnp.maximum(h1 + b1_ref[...], 0.0)                  # b1: (H1, 1)

    # fc2 + relu : (H2, H1) @ (H1, TB) -> (H2, TB)
    h2 = jnp.dot(w2_ref[...], h1.astype(w2_ref.dtype),
                 preferred_element_type=jnp.float32)
    h2 = jnp.maximum(h2 + b2_ref[...], 0.0)

    # fc3 (+ tanh for the actor head) : (D_out, H2) @ (H2, TB) -> (D_out, TB)
    h3 = jnp.dot(w3_ref[...], h2.astype(w3_ref.dtype),
                 preferred_element_type=jnp.float32)
    h3 = h3 + b3_ref[...]
    if actor:
        h3 = jnp.tanh(h3)

    outT_ref[...] = h3.astype(outT_ref.dtype)


# --------------------------------------------------------------------------
# One-time parameter preparation (do this once, not per forward call):
#   * weights stay in PyTorch (out_features, in_features) layout but are
#     pre-cast to the MXU compute dtype (default bf16),
#   * biases become f32 (H, 1) columns (broadcast over the lane/batch axis).
# --------------------------------------------------------------------------
def prepare_params(params, compute_dtype=jnp.bfloat16):
    cd = jnp.dtype(compute_dtype)
    return {
        "w1": jnp.asarray(params["w1"], cd),                 # (H1, D_in)
        "w2": jnp.asarray(params["w2"], cd),                 # (H2, H1)
        "w3": jnp.asarray(params["w3"], cd),                 # (D_out, H2)
        "b1": jnp.asarray(params["b1"], jnp.float32)[:, None],   # (H1, 1)
        "b2": jnp.asarray(params["b2"], jnp.float32)[:, None],   # (H2, 1)
        "b3": jnp.asarray(params["b3"], jnp.float32)[:, None],   # (D_out, 1)
    }


# --------------------------------------------------------------------------
# Forward pass.
# --------------------------------------------------------------------------
@functools.partial(jax.jit, static_argnames=("actor",))
def network_forward(x, prepared, *, actor: bool):
    """Pallas forward pass. `prepared` comes from prepare_params()."""
    if x.ndim == 1:
        x = x[None, :]                                       # mimic unsqueeze(0)

    out_dtype = x.dtype
    w1, b1 = prepared["w1"], prepared["b1"]
    w2, b2 = prepared["w2"], prepared["b2"]
    w3, b3 = prepared["w3"], prepared["b3"]
    compute_dtype = w1.dtype

    batch, d_in = x.shape
    h1_dim = w1.shape[0]
    h2_dim = w2.shape[0]
    d_out = w3.shape[0]

    # Batch-on-lanes layout: transpose (and cast) x in the wrapper.
    xT = x.T.astype(compute_dtype)                           # (D_in, B)

    # Grid policy: one step for small batches (step overhead dominates on
    # single-TC v5e/v6e); otherwise two lane-dense tiles (multiple of 128)
    # so both v7x TensorCores get work, capped at 2048 lanes per tile.
    if batch <= 256:
        tb = batch                                           # full-extent block
    else:
        tb = min(pl.cdiv(pl.cdiv(batch, 2), 128) * 128, 2048)
    grid = (pl.cdiv(batch, tb),)

    def resident(arr):  # tiny weights/biases: same block for every grid step
        return pl.BlockSpec(arr.shape, lambda i: (0, 0))

    param_bytes = sum(int(p.size) * p.dtype.itemsize
                      for p in (w1, b1, w2, b2, w3, b3))
    cost = pl.CostEstimate(
        flops=int(2 * batch * (d_in * h1_dim + h1_dim * h2_dim + h2_dim * d_out)),
        transcendentals=int(batch * d_out) if actor else 0,
        bytes_accessed=int(xT.size) * xT.dtype.itemsize
                       + int(batch * d_out) * jnp.dtype(out_dtype).itemsize
                       + param_bytes,
    )

    outT = pl.pallas_call(
        functools.partial(_mlp_kernel, actor=actor),
        out_shape=jax.ShapeDtypeStruct((d_out, batch), out_dtype),
        grid=grid,
        in_specs=[
            pl.BlockSpec((d_in, tb), lambda i: (0, i)),      # x^T: tiled on batch lanes
            resident(w1), resident(b1),
            resident(w2), resident(b2),
            resident(w3), resident(b3),
        ],
        out_specs=pl.BlockSpec((d_out, tb), lambda i: (0, i)),   # lane-dense store
        compiler_params=pltpu.CompilerParams(
            dimension_semantics=("parallel",),               # megacore on v7x
            vmem_limit_bytes=4 * 1024 * 1024,                # tight, realistic budget
        ),
        cost_estimate=cost,
    )(xT, w1, b1, w2, b2, w3, b3)

    return outT.T                                            # (B, D_out)


# --------------------------------------------------------------------------
# Init mirroring Network.reset_parameters (incl. its fan_in = out_features
# quirk, which is intentional to match the PyTorch original).
# --------------------------------------------------------------------------
def init_params(key, input_dim, hidden_in_dim, hidden_out_dim, output_dim):
    k1, k2, k3, k4, k5, k6 = jax.random.split(key, 6)
    lim1 = 1.0 / jnp.sqrt(hidden_in_dim)      # fan_in = weight.size()[0]
    lim2 = 1.0 / jnp.sqrt(hidden_out_dim)
    return {
        "w1": jax.random.uniform(k1, (hidden_in_dim, input_dim),
                                 jnp.float32, -lim1, lim1),
        "b1": jax.random.uniform(k4, (hidden_in_dim,),
                                 jnp.float32, -lim1, lim1),
        "w2": jax.random.uniform(k2, (hidden_out_dim, hidden_in_dim),
                                 jnp.float32, -lim2, lim2),
        "b2": jax.random.uniform(k5, (hidden_out_dim,),
                                 jnp.float32, -lim2, lim2),
        "w3": jax.random.uniform(k3, (output_dim, hidden_out_dim),
                                 jnp.float32, -0.003, 0.003),
        "b3": jax.random.uniform(k6, (output_dim,),
                                 jnp.float32, -0.003, 0.003),
    }


if __name__ == "__main__":
    key = jax.random.PRNGKey(0)
    kx, kxl, kxr, kp = jax.random.split(key, 4)

    input_dim, hidden_in_dim, hidden_out_dim, output_dim = 24, 32, 32, 2
    batch_small = 2
    batch_large = 1024          # exercises the 2-tile lane-dense grid
    batch_ragged = 1000         # exercises the ragged last tile

    params = init_params(kp, input_dim, hidden_in_dim, hidden_out_dim,
                         output_dim)
    prepared_bf16 = prepare_params(params)                     # default bf16 MXU operands
    prepared_f32 = prepare_params(params, compute_dtype=jnp.float32)

    x_small = jax.random.normal(kx, (batch_small, input_dim), jnp.float32)
    x_large = jax.random.normal(kxl, (batch_large, input_dim), jnp.float32)
    x_ragged = jax.random.normal(kxr, (batch_ragged, input_dim), jnp.float32)
    x_1d = x_small[0]                          # 1-D path (unsqueeze)

    # Plain-JAX reference (original (out,in) weight layout).
    def ref(x, p, actor):
        if x.ndim == 1:
            x = x[None, :]
        h1 = jax.nn.relu(x @ p["w1"].T + p["b1"])
        h2 = jax.nn.relu(h1 @ p["w2"].T + p["b2"])
        h3 = h2 @ p["w3"].T + p["b3"]
        return jnp.tanh(h3) if actor else h3

    # Small batch, actor + critic heads, f32 compute path (tight tolerance).
    out_actor = network_forward(x_small, prepared_f32, actor=True)
    out_critic = network_forward(x_small, prepared_f32, actor=False)
    out_1d = network_forward(x_1d, prepared_f32, actor=True)

    # Training-size batch: tiled grid, parallel batch axis, f32 + bf16 paths.
    out_actor_lg = network_forward(x_large, prepared_f32, actor=True)
    out_critic_lg = network_forward(x_large, prepared_f32, actor=False)
    out_actor_bf16 = network_forward(x_large, prepared_bf16, actor=True)

    # Ragged batch on the default bf16 path (last tile OOB-masked).
    out_critic_rg = network_forward(x_ragged, prepared_bf16, actor=False)

    jax.block_until_ready((out_actor, out_critic, out_1d, out_actor_lg,
                           out_critic_lg, out_actor_bf16, out_critic_rg))

    assert jnp.allclose(out_actor, ref(x_small, params, True), atol=1e-5)
    assert jnp.allclose(out_critic, ref(x_small, params, False), atol=1e-5)
    assert jnp.allclose(out_1d, ref(x_1d, params, True), atol=1e-5)
    assert jnp.allclose(out_actor_lg, ref(x_large, params, True), atol=1e-5)
    assert jnp.allclose(out_critic_lg, ref(x_large, params, False), atol=1e-5)
    assert jnp.allclose(out_actor_bf16, ref(x_large, params, True), atol=3e-2)
    assert jnp.allclose(out_critic_rg, ref(x_ragged, params, False), atol=3e-2)

    print("KERNEL_OK")
</pallas_src>

<mosaic_0001>
module attributes {stable_mosaic.version = 11 : i64} {
  func.func @_mlp_kernel(%arg0: i32, %arg1: memref<24x2xf32, #tpu.memory_space<vmem>>, %arg2: memref<32x24xf32, #tpu.memory_space<vmem>>, %arg3: memref<32x1xf32, #tpu.memory_space<vmem>>, %arg4: memref<32x32xf32, #tpu.memory_space<vmem>>, %arg5: memref<32x1xf32, #tpu.memory_space<vmem>>, %arg6: memref<2x32xf32, #tpu.memory_space<vmem>>, %arg7: memref<2x1xf32, #tpu.memory_space<vmem>>, %arg8: memref<2x2xf32, #tpu.memory_space<vmem>>) attributes {dimension_semantics = [#tpu.dimension_semantics<parallel>], iteration_bounds = array<i64: 1>, scalar_prefetch = 0 : i64, scratch_operands = 0 : i64, tpu.core_type = #tpu.core_type<tc>, window_params = [{transform_indices = @transform_0, window_bounds = array<i64: 24, 2>}, {pipeline_mode = #tpu.pipeline_mode<synchronous>, transform_indices = @transform_1, window_bounds = array<i64: 32, 24>}, {pipeline_mode = #tpu.pipeline_mode<synchronous>, transform_indices = @transform_2, window_bounds = array<i64: 32, 1>}, {pipeline_mode = #tpu.pipeline_mode<synchronous>, transform_indices = @transform_3, window_bounds = array<i64: 32, 32>}, {pipeline_mode = #tpu.pipeline_mode<synchronous>, transform_indices = @transform_4, window_bounds = array<i64: 32, 1>}, {pipeline_mode = #tpu.pipeline_mode<synchronous>, transform_indices = @transform_5, window_bounds = array<i64: 2, 32>}, {pipeline_mode = #tpu.pipeline_mode<synchronous>, transform_indices = @transform_6, window_bounds = array<i64: 2, 1>}, {transform_indices = @transform_7, window_bounds = array<i64: 2, 2>}]} {
    %c0 = arith.constant 0 : index
    %c0_0 = arith.constant 0 : index
    %0 = vector.load %arg1[%c0, %c0_0] : memref<24x2xf32, #tpu.memory_space<vmem>>, vector<24x2xf32>
    %c0_1 = arith.constant 0 : index
    %c0_2 = arith.constant 0 : index
    %1 = vector.load %arg2[%c0_1, %c0_2] : memref<32x24xf32, #tpu.memory_space<vmem>>, vector<32x24xf32>
    %cst = arith.constant dense<0.000000e+00> : vector<32x2xf32>
    %2 = tpu.matmul %1, %0, %cst {dimension_numbers = #tpu.dot_dimension_numbers<[1], [0], [0], [1], [0, 0, 1, 1], [], []>} : vector<32x24xf32>, vector<24x2xf32>, vector<32x2xf32> -> vector<32x2xf32>
    %c0_3 = arith.constant 0 : index
    %c0_4 = arith.constant 0 : index
    %3 = vector.load %arg3[%c0_3, %c0_4] : memref<32x1xf32, #tpu.memory_space<vmem>>, vector<32x1xf32>
    %4 = vector.broadcast %3 : vector<32x1xf32> to vector<32x2xf32>
    %5 = arith.addf %2, %4 : vector<32x2xf32>
    %cst_5 = arith.constant 0.000000e+00 : f32
    %6 = vector.broadcast %cst_5 : f32 to vector<32x2xf32>
    %7 = arith.maximumf %5, %6 : vector<32x2xf32>
    %c0_6 = arith.constant 0 : index
    %c0_7 = arith.constant 0 : index
    %8 = vector.load %arg4[%c0_6, %c0_7] : memref<32x32xf32, #tpu.memory_space<vmem>>, vector<32x32xf32>
    %cst_8 = arith.constant dense<0.000000e+00> : vector<32x2xf32>
    %9 = tpu.matmul %8, %7, %cst_8 {dimension_numbers = #tpu.dot_dimension_numbers<[1], [0], [0], [1], [0, 0, 1, 1], [], []>} : vector<32x32xf32>, vector<32x2xf32>, vector<32x2xf32> -> vector<32x2xf32>
    %c0_9 = arith.constant 0 : index
    %c0_10 = arith.constant 0 : index
    %10 = vector.load %arg5[%c0_9, %c0_10] : memref<32x1xf32, #tpu.memory_space<vmem>>, vector<32x1xf32>
    %11 = vector.broadcast %10 : vector<32x1xf32> to vector<32x2xf32>
    %12 = arith.addf %9, %11 : vector<32x2xf32>
    %cst_11 = arith.constant 0.000000e+00 : f32
    %13 = vector.broadcast %cst_11 : f32 to vector<32x2xf32>
    %14 = arith.maximumf %12, %13 : vector<32x2xf32>
    %c0_12 = arith.constant 0 : index
    %c0_13 = arith.constant 0 : index
    %15 = vector.load %arg6[%c0_12, %c0_13] : memref<2x32xf32, #tpu.memory_space<vmem>>, vector<2x32xf32>
    %cst_14 = arith.constant dense<0.000000e+00> : vector<2x2xf32>
    %16 = tpu.matmul %15, %14, %cst_14 {dimension_numbers = #tpu.dot_dimension_numbers<[1], [0], [0], [1], [0, 0, 1, 1], [], []>} : vector<2x32xf32>, vector<32x2xf32>, vector<2x2xf32> -> vector<2x2xf32>
    %c0_15 = arith.constant 0 : index
    %c0_16 = arith.constant 0 : index
    %17 = vector.load %arg7[%c0_15, %c0_16] : memref<2x1xf32, #tpu.memory_space<vmem>>, vector<2x1xf32>
    %18 = vector.broadcast %17 : vector<2x1xf32> to vector<2x2xf32>
    %19 = arith.addf %16, %18 : vector<2x2xf32>
    %20 = math.tanh %19 : vector<2x2xf32>
    %c0_17 = arith.constant 0 : index
    %c0_18 = arith.constant 0 : index
    %21 = vector.load %arg8[%c0_17, %c0_18] : memref<2x2xf32, #tpu.memory_space<vmem>>, vector<2x2xf32>
    tpu.vector_store %arg8[%c0_17, %c0_18], %20 {strides = array<i32>} : memref<2x2xf32, #tpu.memory_space<vmem>>, vector<2x2xf32>,
    return
  }
  func.func @transform_0(%arg0: i32) -> (i32, i32) {
    %c0_i32 = arith.constant 0 : i32
    %c0_i32_0 = arith.constant 0 : i32
    return %c0_i32, %arg0 : i32, i32
  }
  func.func @transform_1(%arg0: i32) -> (i32, i32) {
    %c0_i32 = arith.constant 0 : i32
    %c0_i32_0 = arith.constant 0 : i32
    %c0_i32_1 = arith.constant 0 : i32
    return %c0_i32, %c0_i32_0 : i32, i32
  }
  func.func @transform_2(%arg0: i32) -> (i32, i32) {
    %c0_i32 = arith.constant 0 : i32
    %c0_i32_0 = arith.constant 0 : i32
    %c0_i32_1 = arith.constant 0 : i32
    return %c0_i32, %c0_i32_0 : i32, i32
  }
  func.func @transform_3(%arg0: i32) -> (i32, i32) {
    %c0_i32 = arith.constant 0 : i32
    %c0_i32_0 = arith.constant 0 : i32
    %c0_i32_1 = arith.constant 0 : i32
    return %c0_i32, %c0_i32_0 : i32, i32
  }
  func.func @transform_4(%arg0: i32) -> (i32, i32) {
    %c0_i32 = arith.constant 0 : i32
    %c0_i32_0 = arith.constant 0 : i32
    %c0_i32_1 = arith.constant 0 : i32
    return %c0_i32, %c0_i32_0 : i32, i32
  }
  func.func @transform_5(%arg0: i32) -> (i32, i32) {
    %c0_i32 = arith.constant 0 : i32
    %c0_i32_0 = arith.constant 0 : i32
    %c0_i32_1 = arith.constant 0 : i32
    return %c0_i32, %c0_i32_0 : i32, i32
  }
  func.func @transform_6(%arg0: i32) -> (i32, i32) {
    %c0_i32 = arith.constant 0 : i32
    %c0_i32_0 = arith.constant 0 : i32
    %c0_i32_1 = arith.constant 0 : i32
    return %c0_i32, %c0_i32_0 : i32, i32
  }
  func.func @transform_7(%arg0: i32) -> (i32, i32) {
    %c0_i32 = arith.constant 0 : i32
    %c0_i32_0 = arith.constant 0 : i32
    return %c0_i32, %arg0 : i32, i32
  }
}

</mosaic_0001>

<bundles_post_ra>
// kernel: network_forward.1
= control target key start
LH: loop header
LB: loop body
LE: loop exit
PB: predicated region body
PF: predicated region fallthrough
CT: control target
= control target key end

     0   :  { %vm57_vm0 = vcmask 195584   ;;  %v468_v2 = vmov 0   ;;  %vm187_vm1 = vcmask 261120   ;;  %v469_v40 = vmov 0.0|0.0   ;;  %s587_s0 = inlined_call_operand.vmem [shape: f32[24,2], index: 0, kind: input, shape index: {}]   ;;  %s588_s1 = inlined_call_operand.vmem [shape: f32[32,24], index: 1, kind: input, shape index: {}]   ;;  %s589_s2 = inlined_call_operand.vmem [shape: f32[32,1], index: 2, kind: input, shape index: {}]   ;;  %s590_s4 = inlined_call_operand.vmem [shape: f32[32,1], index: 4, kind: input, shape index: {}]   ;;  %s591_s6 = inlined_call_operand.vmem [shape: f32[2,1], index: 6, kind: input, shape index: {}]   ;;  %s592_s3 = inlined_call_operand.vmem [shape: f32[32,32], index: 3, kind: input, shape index: {}]   ;;  %s593_s5 = inlined_call_operand.vmem [shape: f32[2,32], index: 5, kind: input, shape index: {}]   ;;  %s594_s7 = inlined_call_operand.vmem [shape: f32[2,2], index: 7, kind: output, shape index: {}]  }
   0x1   :  { %v26_v0 = vld [vmem:[%s587_s0] sm:$0xff]  ;;  %v27_v1 = vld [vmem:[%s587_s0 + $0x8] sm:$0xff]  ;;  %464 = vset.pattern.permute.xlu0 %v468_v2  ;;  %465 = vset.pattern.permute.xlu1 %v468_v2  ;;  %v28_v5 = vld [vmem:[%s587_s0 + $0x10] sm:$0xff]  ;;  %vm470_vm2 = vmmov 0   ;;  %v471_v41 = vmov 0.0   ;;  %vm370_vm3 = vcmask 9216  }
   0x2   :  { %v442_v3 = vpack.c.bf16 %v27_v1, %v26_v0  ;;  %v29_v4 = vld [vmem:[%s588_s1] sm:$0xff]  ;;  %v35_v7 = vld [vmem:[%s589_s2 + $0x10] sm:$0xff]  ;;  %v34_v8 = vld [vmem:[%s589_s2 + $0x8] sm:$0xff] }
   0x3   :  { %411 = vmatprep.mubr.msk.f32.mxu0 %vm57_vm0, %v29_v4  ;;  %v33_v6 = vld [vmem:[%s589_s2] sm:$0xff]  ;;  %49 = vperm.xlu1 %465, %v35_v7   ;;  %v36_v9 = vld [vmem:[%s589_s2 + $0x18] sm:$0xff]  ;;  %v30_v10 = vld [vmem:[%s588_s1 + $0x8] sm:$0xff] }
   0x4   :  { %443 = vmatprep.subr.bf16.mxu0 %v442_v3  ;;  %39 = vperm.xlu0 %464, %v33_v6   ;;  %v31_v11 = vld [vmem:[%s588_s1 + $0x10] sm:$0xff]  ;;  %v163_v12 = vld [vmem:[%s590_s4] sm:$0xff]  ;;  %v164_v13 = vld [vmem:[%s590_s4 + $0x8] sm:$0xff] }
   0x5   :  { %445 = vmatpush3.bf16.msra.mxu0 %v442_v3  ;;  %v32_v14 = vld [vmem:[%s588_s1 + $0x18] sm:$0xff]  ;;  %v165_v15 = vld [vmem:[%s590_s4 + $0x10] sm:$0xff]  ;;  %v290_v17 = vld [vmem:[%s591_s6] sm:$0x3] }
   0x6   :  { %409 = vmatprep.subr.mxu0 %v28_v5  ;;  %v166_v16 = vld [vmem:[%s590_s4 + $0x18] sm:$0xff]  ;;  %v159_v18 = vld [vmem:[%s592_s3] sm:$0xff]  ;;  %v160_v37 = vld [vmem:[%s592_s3 + $0x8] sm:$0xff] }
   0x7   :  { %54 = vperm.xlu1 %465, %v36_v9   ;;  %425 = vmatprep.mubr.msk.f32.mxu1 %vm187_vm1, %v159_v18  ;;  %v161_v38 = vld [vmem:[%s592_s3 + $0x10] sm:$0xff]  ;;  %v162_v39 = vld [vmem:[%s592_s3 + $0x18] sm:$0xff]  ;;  %v289_v60 = vld [vmem:[%s593_s5] sm:$0x3] }
   0x8   :  { %44 = vperm.xlu0 %464, %v34_v8  }
   0x9   :  { %410 = vmatpush3.msra.mxu0 %v28_v5 }
   0xa   :  { %412 = vmatmul.mubr.msk.f32.vlgmr.msra.gmra.mrb[0].mxu0 %vm57_vm0, %v30_v10  ;;  %454 = vmatprep.subr.bf16.mxu0 %v469_v40 }
   0xb   :  { %414 = vmatprep.mubr.msk.f32.mxu0 %vm57_vm0, %v31_v11  ;;  %174 = vperm.xlu1 %465, %v164_v13  }
   0xc   :  { %169 = vperm.xlu0 %464, %v163_v12  }
   0xe   :  { %415 = vmatmul.mubr.msk.f32.gmra.mrb[2].mxu0 %vm57_vm0, %v32_v14 }
   0xf   :  { %184 = vperm.xlu1 %465, %v166_v16   ;;  %439 = vmatprep.mubr.msk.f32.mxu0 %vm470_vm2, %v471_v41 }
  0x10   :  { %179 = vperm.xlu0 %464, %v165_v15  }
  0x14   :  { %293 = vperm.xlu0 %464, %v290_v17  }
  0x82   :  { %v50_v20 = vpop.permute.xlu1 %49 }
  0x83   :  { %v40_v19 = vpop.permute.xlu0 %39 }
  0x86   :  { %v55_v27 = vpop.permute.xlu1 %54 }
  0x87   :  { %v45_v21 = vpop.permute.xlu0 %44 }
  0x8a   :  { %v175_v42 = vpop.permute.xlu1 %174 }
  0x8b   :  { %v170_v43 = vpop.permute.xlu0 %169 }
  0x8e   :  { %v185_v49 = vpop.permute.xlu1 %184 }
  0x8f   :  { %v180_v52 = vpop.permute.xlu0 %179 }
  0x93   :  { %v294_v61 = vpop.permute.xlu0 %293 }
  0xdd   :  { %v413_v22 = vpop.f32.mrb[0].mxu0 }
  0xde   :  { %v142_v23 = vadd.f32 %v413_v22, %v45_v21  ;;  %v136_v24 = vpop.f32.mrb[1].mxu0 }
  0xdf   :  { %v137_v25 = vadd.f32 %v136_v24, %v40_v19 }
  0xe0   :  { %v156_v26 = vmax.f32 %v142_v23, 0.0 }
  0xe1   :  { %v155_v28 = vmax.f32 %v137_v25, 0.0  ;;  %v416_v29 = vpop.f32.mrb[2].mxu0 }
  0xe2   :  { %v152_v30 = vadd.f32 %v416_v29, %v55_v27  ;;  %v146_v31 = vpop.f32.mrb[3].mxu0 }
  0xe3   :  { %v147_v32 = vadd.f32 %v146_v31, %v50_v20  ;;  %v446_v33 = vpack.c.bf16 %v156_v26, %v155_v28 }
  0xe4   :  { %v158_v34 = vmax.f32 %v152_v30, 0.0 }
  0xe5   :  { %v157_v35 = vmax.f32 %v147_v32, 0.0  ;;  %447 = vmatprep.subr.bf16.mxu1 %v446_v33 }
  0xe6   :  { %449 = vmatpush3.bf16.msra.mxu1 %v446_v33 }
  0xe7   :  { %v450_v36 = vpack.c.bf16 %v158_v34, %v157_v35 }
  0xe9   :  { %451 = vmatprep.subr.bf16.mxu1 %v450_v36 }
  0xea   :  { %453 = vmatpush3.bf16.msra.mxu1 %v450_v36 }
  0xed   :  { %426 = vmatmul.mubr.msk.f32.vlgmr.msra.gmra.mrb[0].mxu1 %vm187_vm1, %v160_v37 }
  0xee   :  { %428 = vmatprep.mubr.msk.f32.mxu1 %vm187_vm1, %v161_v38 }
  0xf1   :  { %429 = vmatmul.mubr.msk.f32.gmra.mrb[2].mxu1 %vm187_vm1, %v162_v39 }
 0x1c0   :  { %v427_v44 = vpop.f32.mrb[0].mxu1 }
 0x1c1   :  { %v272_v45 = vadd.f32 %v427_v44, %v175_v42  ;;  %v266_v46 = vpop.f32.mrb[1].mxu1 }
 0x1c2   :  { %v267_v47 = vadd.f32 %v266_v46, %v170_v43 }
 0x1c3   :  { %v286_v48 = vmax.f32 %v272_v45, 0.0 }
 0x1c4   :  { %v285_v50 = vmax.f32 %v267_v47, 0.0  ;;  %v430_v51 = vpop.f32.mrb[2].mxu1 }
 0x1c5   :  { %v282_v53 = vadd.f32 %v430_v51, %v185_v49  ;;  %v276_v54 = vpop.f32.mrb[3].mxu1 }
 0x1c6   :  { %v455_v55 = vpack.c.bf16 %v286_v48, %v285_v50  ;;  %v277_v56 = vadd.f32 %v276_v54, %v180_v52 }
 0x1c7   :  { %v288_v57 = vmax.f32 %v282_v53, 0.0 }
 0x1c8   :  { %v287_v58 = vmax.f32 %v277_v56, 0.0  ;;  %456 = vmatpush3.bf16.msra.mxu0 %v455_v55 }
 0x1c9   :  { %457 = vmatprep.subr.bf16.mxu0 %v469_v40 }
 0x1ca   :  { %v458_v59 = vpack.c.bf16 %v288_v57, %v287_v58 }
 0x1cc   :  { %459 = vmatpush3.bf16.msra.mxu0 %v458_v59 }
 0x1cf   :  { %440 = vmatmul.mubr.msk.f32.vlgmr.msra.gmra.mrb[4].mxu0 %vm187_vm1, %v289_v60 }
 0x2a2   :  { %v365_v62 = vpop.f32.mrb[4].mxu0 }
 0x2a3   :  { %v366_v63 = vadd.f32 %v365_v62, %v294_v61  ;;  %v441_v0 = vpop.f32.mrb[5].mxu0 }
 0x2a5   :  { %466 = vtanh.f32 %v366_v63 }
 0x2af   :  { %v467_v1 = vpop.eup %466 }
 0x2b0   :  { %371 = vst.msk [vmem:[%s594_s7] sm:$0x3] %vm370_vm3, %v467_v1 }

</bundles_post_ra>
